<compile_context>
chip_gen: v7x
topology: tpu7x:2x2x1
jax: 0.10.0
libtpu: 0.0.40
codegen_flags: <defaults>
</compile_context>

<pallas_src>
import math
from functools import partial

import jax
import jax.numpy as jnp
from jax import lax
from jax.experimental import pallas as pl
from jax.experimental.pallas import tpu as pltpu


def _round_up(v, m):
    return ((v + m - 1) // m) * m


# ---------------------------------------------------------------------------
# Fused, time-chunked, closed-loop kernel.
# ---------------------------------------------------------------------------
def _ann_close_kernel(x_ref, yobs_ref, wx_ref, consts_ref, whh_ref, bho_ref,
                      out_ref, pre_ref, yt_ref):
    c = pl.program_id(1)  # time-chunk index (sequential, "arbitrary")

    @pl.when(c == 0)
    def _():              # yt starts at zero (torch.zeros(ngrid, 1))
        yt_ref[...] = jnp.zeros_like(yt_ref)

    t_chunk, g_tile, nx = x_ref.shape
    hp = whh_ref.shape[0]

    b_i2h = consts_ref[0:1, :]   # (1, Hp) i2h bias
    w_y   = consts_ref[1:2, :]   # (1, Hp) i2h column multiplying the fed-back yt
    b_h2h = consts_ref[2:3, :]   # (1, Hp)
    w_ho  = consts_ref[3:4, :]   # (1, Hp) h2o row (ny == 1)
    b_ho  = bho_ref[...]         # (1, 1)

    # Hoisted input projection for the whole chunk: one MXU matmul.
    xc = x_ref[...].reshape(t_chunk * g_tile, nx)
    pre = jnp.dot(xc, wx_ref[...], preferred_element_type=jnp.float32) + b_i2h
    pre_ref[...] = pre.reshape(t_chunk, g_tile, hp)

    def step(s, carry):
        obs = yobs_ref[s]                                    # (G, 1)
        # fillObs: take the observation where present (non-NaN), else keep the
        # closed-loop prediction carried from the previous step.
        yt = jnp.where(jnp.isnan(obs), yt_ref[...], obs)     # (G, 1)
        # ht = relu(i2h([x_t, yt])): x part precomputed, yt part is rank-1.
        ht = jnp.maximum(pre_ref[s] + yt * w_y, 0.0)         # (G, Hp)
        # ht2 = h2h(ht)
        ht2 = jnp.dot(ht, whh_ref[...],
                      preferred_element_type=jnp.float32) + b_h2h
        # yt = h2o(ht2), ny == 1 -> lane reduction (XLU) instead of an N=1 matmul.
        y_new = jnp.sum(ht2 * w_ho, axis=-1, keepdims=True) + b_ho   # (G, 1)
        out_ref[s] = y_new
        yt_ref[...] = y_new
        return carry

    lax.fori_loop(0, t_chunk, step, 0)


# ---------------------------------------------------------------------------
# Tile selection: keep per-chunk VMEM well under the 32 MiB scoped limit
# (fits v7x's 64 MiB physical VMEM with double buffering headroom).
# ---------------------------------------------------------------------------
def _choose_tiles(nt, ngrid, hp, nx):
    g_tile = min(_round_up(ngrid, 8), 128)
    # Per-time-step VMEM cost (bytes).  x / y / out blocks are lane-padded to
    # 128 inside VMEM (their last dims are nx / 1); pre scratch is dense.
    x_row = g_tile * _round_up(nx, 128) * 4
    io_row = g_tile * 128 * 4 * 2          # y + out slabs
    pre_row = g_tile * hp * 4
    per_step = pre_row + 2 * (x_row + io_row)   # 2x: pipeline double buffering
    budget = 12 * 1024 * 1024
    t_chunk = max(8, min(128, (budget // per_step) // 8 * 8))
    t_chunk = min(t_chunk, _round_up(nt, 8))
    return g_tile, t_chunk


# ---------------------------------------------------------------------------
# One-time weight padding / transposes (do this once and reuse across calls).
# ---------------------------------------------------------------------------
def prepare_params(params):
    f32 = jnp.float32
    h, nxp1 = params["w_i2h"].shape
    nx = nxp1 - 1
    ny = params["w_h2o"].shape[0]
    assert ny == 1, "closed-loop feedback in AnnCloseModel implies ny == 1"
    hp = _round_up(h, 128)

    w_i2h = params["w_i2h"].astype(f32)
    wxT = jnp.zeros((nx, hp), f32).at[:, :h].set(w_i2h[:, :nx].T)
    consts = jnp.zeros((4, hp), f32)
    consts = consts.at[0, :h].set(params["b_i2h"].astype(f32))     # b_i2h
    consts = consts.at[1, :h].set(w_i2h[:, nx])                    # w_y
    consts = consts.at[2, :h].set(params["b_h2h"].astype(f32))     # b_h2h
    consts = consts.at[3, :h].set(params["w_h2o"].astype(f32)[0])  # w_ho
    whhT = jnp.zeros((hp, hp), f32).at[:h, :h].set(
        params["w_h2h"].astype(f32).T)
    bho = params["b_h2o"].astype(f32).reshape(1, 1)
    return dict(wxT=wxT, consts=consts, whhT=whhT, bho=bho)


def ann_close_forward(x, y, prep, *, fillObs=True):
    """x: (nt, ngrid, nx); y: (nt, ngrid, 1) with NaN = missing observation.
    prep: output of prepare_params(). Returns (nt, ngrid, 1)."""
    nt, ngrid, nx = x.shape
    assert prep["wxT"].shape[0] == nx
    hp = prep["whhT"].shape[0]
    f32 = jnp.float32

    g_tile, t_chunk = _choose_tiles(nt, ngrid, hp, nx)
    gp = _round_up(ngrid, g_tile)
    ntp = _round_up(nt, t_chunk)
    n_gblk = gp // g_tile
    n_chunks = ntp // t_chunk

    # Pad only the grid dim (to the tile) and the time dim (to the chunk);
    # the feature dim nx stays at its real size (full-extent last-dim block).
    x_p = jnp.zeros((ntp, gp, nx), f32).at[:nt, :ngrid, :].set(x.astype(f32))
    if fillObs and y is not None:
        y_p = jnp.full((ntp, gp, 1), jnp.nan, f32).at[:nt, :ngrid, :].set(
            y.astype(f32))
    else:
        y_p = jnp.full((ntp, gp, 1), jnp.nan, f32)

    out_p = pl.pallas_call(
        _ann_close_kernel,
        out_shape=jax.ShapeDtypeStruct((ntp, gp, 1), f32),
        grid_spec=pltpu.PrefetchScalarGridSpec(
            num_scalar_prefetch=0,
            grid=(n_gblk, n_chunks),
            in_specs=[
                pl.BlockSpec((t_chunk, g_tile, nx), lambda g, c: (c, g, 0)),  # x
                pl.BlockSpec((t_chunk, g_tile, 1), lambda g, c: (c, g, 0)),   # y obs
                pl.BlockSpec((nx, hp), lambda g, c: (0, 0)),                  # wxT
                pl.BlockSpec((4, hp), lambda g, c: (0, 0)),                   # consts
                pl.BlockSpec((hp, hp), lambda g, c: (0, 0)),                  # whhT
                pl.BlockSpec((1, 1), lambda g, c: (0, 0)),                    # bho
            ],
            out_specs=pl.BlockSpec((t_chunk, g_tile, 1), lambda g, c: (c, g, 0)),
            scratch_shapes=[
                pltpu.VMEM((t_chunk, g_tile, hp), f32),  # per-chunk input projection
                pltpu.VMEM((g_tile, 1), f32),            # carried closed-loop yt
            ],
        ),
        compiler_params=pltpu.CompilerParams(
            dimension_semantics=("parallel", "arbitrary"),
            vmem_limit_bytes=32 * 1024 * 1024),
    )(x_p, y_p, prep["wxT"], prep["consts"], prep["whhT"], prep["bho"])

    return out_p[:nt, :ngrid, :]


# ---------------------------------------------------------------------------
# Parameter init (nn.Linear-style uniform) and pure-JAX reference
# ---------------------------------------------------------------------------
def init_params(key, nx, ny, hidden):
    ks = jax.random.split(key, 6)

    def lin(kw, kb, fan_in, fan_out):
        bound = 1.0 / math.sqrt(fan_in)
        w = jax.random.uniform(kw, (fan_out, fan_in), jnp.float32, -bound, bound)
        b = jax.random.uniform(kb, (fan_out,), jnp.float32, -bound, bound)
        return w, b

    w_i2h, b_i2h = lin(ks[0], ks[1], nx + 1, hidden)
    w_h2h, b_h2h = lin(ks[2], ks[3], hidden, hidden)
    w_h2o, b_h2o = lin(ks[4], ks[5], hidden, ny)
    return dict(w_i2h=w_i2h, b_i2h=b_i2h, w_h2h=w_h2h, b_h2h=b_h2h,
                w_h2o=w_h2o, b_h2o=b_h2o)


def _reference(x, y, params, fillObs=True):
    nt, ngrid, _ = x.shape
    ny = params["w_h2o"].shape[0]
    yt = jnp.zeros((ngrid, ny), jnp.float32)
    outs = []
    for t in range(nt):
        if fillObs and y is not None:
            obs = y[t]
            yt = jnp.where(jnp.isnan(obs), yt, obs)
        xt = jnp.concatenate([x[t], yt], axis=1)
        ht = jax.nn.relu(xt @ params["w_i2h"].T + params["b_i2h"])
        ht2 = ht @ params["w_h2h"].T + params["b_h2h"]
        yt = ht2 @ params["w_h2o"].T + params["b_h2o"]
        outs.append(yt)
    return jnp.stack(outs, axis=0)


if __name__ == "__main__":
    nt, ngrid, nx, hidden, ny = 8, 16, 4, 32, 1

    key = jax.random.PRNGKey(0)
    kx, ky, kmiss, kp = jax.random.split(key, 4)

    x = jax.random.normal(kx, (nt, ngrid, nx), dtype=jnp.float32)
    y_full = jax.random.normal(ky, (nt, ngrid, ny), dtype=jnp.float32)
    # ~40% missing observations (NaN) so the closed-loop feedback is exercised.
    miss = jax.random.bernoulli(kmiss, 0.4, (nt, ngrid, ny))
    y = jnp.where(miss, jnp.nan, y_full)

    params = init_params(kp, nx, ny, hidden)
    prep = prepare_params(params)          # one-time weight padding / transposes

    fwd = jax.jit(partial(ann_close_forward, fillObs=True))
    out = fwd(x, y, prep)
    jax.block_until_ready(out)

    ref = _reference(x, y, params, fillObs=True)
    assert out.shape == (nt, ngrid, ny)
    err = float(jnp.max(jnp.abs(out - ref)))
    assert jnp.allclose(out, ref, atol=1e-4, rtol=1e-4), f"max abs err {err}"

    print("KERNEL_OK")
</pallas_src>

<mosaic_0001>
module attributes {stable_mosaic.version = 11 : i64} {
  func.func @_ann_close_kernel(%arg0: i32, %arg1: i32, %arg2: memref<8x16x4xf32, #tpu.memory_space<vmem>>, %arg3: memref<8x16x1xf32, #tpu.memory_space<vmem>>, %arg4: memref<4x128xf32, #tpu.memory_space<vmem>>, %arg5: memref<4x128xf32, #tpu.memory_space<vmem>>, %arg6: memref<128x128xf32, #tpu.memory_space<vmem>>, %arg7: memref<1x1xf32, #tpu.memory_space<vmem>>, %arg8: memref<8x16x1xf32, #tpu.memory_space<vmem>>, %arg9: memref<8x16x128xf32, #tpu.memory_space<vmem>>, %arg10: memref<16x1xf32, #tpu.memory_space<vmem>>) attributes {dimension_semantics = [#tpu.dimension_semantics<parallel>, #tpu.dimension_semantics<arbitrary>], iteration_bounds = array<i64: 1, 1>, scalar_prefetch = 0 : i64, scratch_operands = 2 : i64, tpu.core_type = #tpu.core_type<tc>, window_params = [{transform_indices = @transform_0, window_bounds = array<i64: 8, 16, 4>}, {transform_indices = @transform_1, window_bounds = array<i64: 8, 16, 1>}, {pipeline_mode = #tpu.pipeline_mode<synchronous>, transform_indices = @transform_2, window_bounds = array<i64: 4, 128>}, {pipeline_mode = #tpu.pipeline_mode<synchronous>, transform_indices = @transform_3, window_bounds = array<i64: 4, 128>}, {pipeline_mode = #tpu.pipeline_mode<synchronous>, transform_indices = @transform_4, window_bounds = array<i64: 128, 128>}, {pipeline_mode = #tpu.pipeline_mode<synchronous>, transform_indices = @transform_5, window_bounds = array<i64: 1, 1>}, {transform_indices = @transform_6, window_bounds = array<i64: 8, 16, 1>}]} {
    %c0_i32 = arith.constant 0 : i32
    %0 = arith.cmpi eq, %arg1, %c0_i32 : i32
    %1 = arith.extui %0 : i1 to i32
    %c0_i32_0 = arith.constant 0 : i32
    %2 = arith.cmpi ne, %1, %c0_i32_0 : i32
    scf.if %2 {
      %cst_17 = arith.constant 0.000000e+00 : f32
      %17 = vector.broadcast %cst_17 : f32 to vector<16x1xf32>
      %c0_18 = arith.constant 0 : index
      %c0_19 = arith.constant 0 : index
      %18 = vector.load %arg10[%c0_18, %c0_19] : memref<16x1xf32, #tpu.memory_space<vmem>>, vector<16x1xf32>
      tpu.vector_store %arg10[%c0_18, %c0_19], %17 {strides = array<i32>} : memref<16x1xf32, #tpu.memory_space<vmem>>, vector<16x1xf32>,
    } else {
    }
    %c0 = arith.constant 0 : index
    %c0_1 = arith.constant 0 : index
    %3 = vector.load %arg5[%c0, %c0_1] : memref<4x128xf32, #tpu.memory_space<vmem>>, vector<1x128xf32>
    %c1 = arith.constant 1 : index
    %c0_2 = arith.constant 0 : index
    %4 = vector.load %arg5[%c1, %c0_2] : memref<4x128xf32, #tpu.memory_space<vmem>>, vector<1x128xf32>
    %c2 = arith.constant 2 : index
    %c0_3 = arith.constant 0 : index
    %5 = vector.load %arg5[%c2, %c0_3] : memref<4x128xf32, #tpu.memory_space<vmem>>, vector<1x128xf32>
    %c3 = arith.constant 3 : index
    %c0_4 = arith.constant 0 : index
    %6 = vector.load %arg5[%c3, %c0_4] : memref<4x128xf32, #tpu.memory_space<vmem>>, vector<1x128xf32>
    %c0_5 = arith.constant 0 : index
    %c0_6 = arith.constant 0 : index
    %7 = vector.load %arg7[%c0_5, %c0_6] : memref<1x1xf32, #tpu.memory_space<vmem>>, vector<1x1xf32>
    %c0_7 = arith.constant 0 : index
    %c0_8 = arith.constant 0 : index
    %c0_9 = arith.constant 0 : index
    %8 = vector.load %arg2[%c0_7, %c0_8, %c0_9] : memref<8x16x4xf32, #tpu.memory_space<vmem>>, vector<8x16x4xf32>
    %9 = vector.shape_cast %8 : vector<8x16x4xf32> to vector<128x4xf32>
    %c0_10 = arith.constant 0 : index
    %c0_11 = arith.constant 0 : index
    %10 = vector.load %arg4[%c0_10, %c0_11] : memref<4x128xf32, #tpu.memory_space<vmem>>, vector<4x128xf32>
    %cst = arith.constant dense<0.000000e+00> : vector<128x128xf32>
    %11 = tpu.matmul %9, %10, %cst {dimension_numbers = #tpu.dot_dimension_numbers<[1], [0], [0], [1], [0, 0, 1, 1], [], []>} : vector<128x4xf32>, vector<4x128xf32>, vector<128x128xf32> -> vector<128x128xf32>
    %12 = vector.broadcast %3 : vector<1x128xf32> to vector<128x128xf32>
    %13 = arith.addf %11, %12 : vector<128x128xf32>
    %14 = vector.shape_cast %13 : vector<128x128xf32> to vector<8x16x128xf32>
    %c0_12 = arith.constant 0 : index
    %c0_13 = arith.constant 0 : index
    %c0_14 = arith.constant 0 : index
    %15 = vector.load %arg9[%c0_12, %c0_13, %c0_14] : memref<8x16x128xf32, #tpu.memory_space<vmem>>, vector<8x16x128xf32>
    tpu.vector_store %arg9[%c0_12, %c0_13, %c0_14], %14 {strides = array<i32>} : memref<8x16x128xf32, #tpu.memory_space<vmem>>, vector<8x16x128xf32>,
    %c0_i32_15 = arith.constant 0 : i32
    %c8_i32 = arith.constant 8 : i32
    %16 = arith.addi %c0_i32_15, %c8_i32 : i32
    %c1_i32 = arith.constant 1 : i32
    scf.for %arg11 = %c0_i32_15 to %16 step %c1_i32  : i32 {
      %17 = arith.index_cast %arg11 : i32 to index
      %c0_17 = arith.constant 0 : index
      %c0_18 = arith.constant 0 : index
      %18 = vector.load %arg3[%17, %c0_17, %c0_18] : memref<8x16x1xf32, #tpu.memory_space<vmem>>, vector<1x16x1xf32>
      %19 = vector.shape_cast %18 : vector<1x16x1xf32> to vector<16x1xf32>
      %20 = arith.cmpf one, %19, %19 : vector<16x1xf32>
      %c0_19 = arith.constant 0 : index
      %c0_20 = arith.constant 0 : index
      %21 = vector.load %arg10[%c0_19, %c0_20] : memref<16x1xf32, #tpu.memory_space<vmem>>, vector<16x1xf32>
      %22 = arith.select %20, %21, %19 : vector<16x1xi1>, vector<16x1xf32>
      %23 = arith.index_cast %arg11 : i32 to index
      %c0_21 = arith.constant 0 : index
      %c0_22 = arith.constant 0 : index
      %24 = vector.load %arg9[%23, %c0_21, %c0_22] : memref<8x16x128xf32, #tpu.memory_space<vmem>>, vector<1x16x128xf32>
      %25 = vector.shape_cast %24 : vector<1x16x128xf32> to vector<16x128xf32>
      %26 = vector.broadcast %22 : vector<16x1xf32> to vector<16x128xf32>
      %27 = vector.broadcast %4 : vector<1x128xf32> to vector<16x128xf32>
      %28 = arith.mulf %26, %27 : vector<16x128xf32>
      %29 = arith.addf %25, %28 : vector<16x128xf32>
      %cst_23 = arith.constant 0.000000e+00 : f32
      %30 = vector.broadcast %cst_23 : f32 to vector<16x128xf32>
      %31 = arith.maximumf %29, %30 : vector<16x128xf32>
      %c0_24 = arith.constant 0 : index
      %c0_25 = arith.constant 0 : index
      %32 = vector.load %arg6[%c0_24, %c0_25] : memref<128x128xf32, #tpu.memory_space<vmem>>, vector<128x128xf32>
      %cst_26 = arith.constant dense<0.000000e+00> : vector<16x128xf32>
      %33 = tpu.matmul %31, %32, %cst_26 {dimension_numbers = #tpu.dot_dimension_numbers<[1], [0], [0], [1], [0, 0, 1, 1], [], []>} : vector<16x128xf32>, vector<128x128xf32>, vector<16x128xf32> -> vector<16x128xf32>
      %34 = vector.broadcast %5 : vector<1x128xf32> to vector<16x128xf32>
      %35 = arith.addf %33, %34 : vector<16x128xf32>
      %36 = vector.broadcast %6 : vector<1x128xf32> to vector<16x128xf32>
      %37 = arith.mulf %35, %36 : vector<16x128xf32>
      %cst_27 = arith.constant dense<0.000000e+00> : vector<16xf32>
      %38 = vector.multi_reduction <add>, %37, %cst_27 [1] : vector<16x128xf32> to vector<16xf32>
      %39 = vector.shape_cast %38 : vector<16xf32> to vector<16x1xf32>
      %40 = vector.broadcast %7 : vector<1x1xf32> to vector<16x1xf32>
      %41 = arith.addf %39, %40 : vector<16x1xf32>
      %42 = arith.index_cast %arg11 : i32 to index
      %c0_28 = arith.constant 0 : index
      %c0_29 = arith.constant 0 : index
      %43 = vector.load %arg8[%42, %c0_28, %c0_29] : memref<8x16x1xf32, #tpu.memory_space<vmem>>, vector<1x16x1xf32>
      %44 = vector.shape_cast %43 : vector<1x16x1xf32> to vector<16x1xf32>
      %45 = vector.shape_cast %41 : vector<16x1xf32> to vector<1x16x1xf32>
      tpu.vector_store %arg8[%42, %c0_28, %c0_29], %45 {strides = array<i32>} : memref<8x16x1xf32, #tpu.memory_space<vmem>>, vector<1x16x1xf32>,
      %c0_30 = arith.constant 0 : index
      %c0_31 = arith.constant 0 : index
      %46 = vector.load %arg10[%c0_30, %c0_31] : memref<16x1xf32, #tpu.memory_space<vmem>>, vector<16x1xf32>
      tpu.vector_store %arg10[%c0_30, %c0_31], %41 {strides = array<i32>} : memref<16x1xf32, #tpu.memory_space<vmem>>, vector<16x1xf32>,
    }
    %c8_i32_16 = arith.constant 8 : i32
    return
  }
  func.func @transform_0(%arg0: i32, %arg1: i32) -> (i32, i32, i32) {
    %c0_i32 = arith.constant 0 : i32
    %c0_i32_0 = arith.constant 0 : i32
    return %arg1, %arg0, %c0_i32 : i32, i32, i32
  }
  func.func @transform_1(%arg0: i32, %arg1: i32) -> (i32, i32, i32) {
    %c0_i32 = arith.constant 0 : i32
    %c0_i32_0 = arith.constant 0 : i32
    return %arg1, %arg0, %c0_i32 : i32, i32, i32
  }
  func.func @transform_2(%arg0: i32, %arg1: i32) -> (i32, i32) {
    %c0_i32 = arith.constant 0 : i32
    %c0_i32_0 = arith.constant 0 : i32
    %c0_i32_1 = arith.constant 0 : i32
    return %c0_i32, %c0_i32_0 : i32, i32
  }
  func.func @transform_3(%arg0: i32, %arg1: i32) -> (i32, i32) {
    %c0_i32 = arith.constant 0 : i32
    %c0_i32_0 = arith.constant 0 : i32
    %c0_i32_1 = arith.constant 0 : i32
    return %c0_i32, %c0_i32_0 : i32, i32
  }
  func.func @transform_4(%arg0: i32, %arg1: i32) -> (i32, i32) {
    %c0_i32 = arith.constant 0 : i32
    %c0_i32_0 = arith.constant 0 : i32
    %c0_i32_1 = arith.constant 0 : i32
    return %c0_i32, %c0_i32_0 : i32, i32
  }
  func.func @transform_5(%arg0: i32, %arg1: i32) -> (i32, i32) {
    %c0_i32 = arith.constant 0 : i32
    %c0_i32_0 = arith.constant 0 : i32
    %c0_i32_1 = arith.constant 0 : i32
    return %c0_i32, %c0_i32_0 : i32, i32
  }
  func.func @transform_6(%arg0: i32, %arg1: i32) -> (i32, i32, i32) {
    %c0_i32 = arith.constant 0 : i32
    %c0_i32_0 = arith.constant 0 : i32
    return %arg1, %arg0, %c0_i32 : i32, i32, i32
  }
}

</mosaic_0001>

<bundles_post_ra>
// kernel: ann_close_forward.1
= control target key start
LH: loop header
LB: loop body
LE: loop exit
PB: predicated region body
PF: predicated region fallthrough
CT: control target
= control target key end

     0   :  { %vm29_vm0 = vcmask 7168   ;;  %vm107_vm1 = vcmask 1043456   ;;  %v617_v1 = vmov 0.0   ;;  %vm58_vm2 = vcmask 31744   ;;  %s830_s1 = inlined_call_operand.vmem [shape: f32[8,16,1], index: 1, kind: input, shape index: {}]   ;;  %s831_s2 = inlined_call_operand.vmem [shape: f32[4,128], index: 2, kind: input, shape index: {}]   ;;  %s832_s4 = inlined_call_operand.vmem [shape: f32[128,128], index: 4, kind: input, shape index: {}]   ;;  %s833_s5 = inlined_call_operand.<no memory space> [shape: f32[1,1], index: 5, kind: input, shape index: {}]   ;;  %s834_s6 = inlined_call_operand.vmem [shape: f32[8,16,1], index: 6, kind: output, shape index: {}]   ;;  %s835_s0 = inlined_call_operand.vmem [shape: f32[8,16,4], index: 0, kind: input, shape index: {}]   ;;  %s836_s3 = inlined_call_operand.vmem [shape: f32[4,128], index: 3, kind: input, shape index: {}]  }
   0x1   :  { %v11_v0 = vstv %s833_s5  ;;  %30 = vst.msk [vmem:[#allocation3] sm:$0xff] %vm29_vm0, %v617_v1  ;;  %31 = vst.msk [vmem:[#allocation3 + $0x8] sm:$0xff] %vm29_vm0, %v617_v1  ;;  %v53_v2 = vld [vmem:[%s831_s2] sm:$0xf]  ;;  %v38_v5 = vld [vmem:[%s835_s0 + $0x8] sm:$0xff] }
   0x2   :  { %v37_v3 = vld [vmem:[%s835_s0] sm:$0xff]  ;;  %12 = vst [vmem:[#allocation4] sm:$0x1] %v11_v0  ;;  %503 = vmatprep.subr.msk.mxu0 %vm107_vm1, %v53_v2  ;;  %596 = vmatprep.subr.msk.mxu1 %vm107_vm1, %v53_v2  ;;  %v46_v6 = vld [vmem:[%s835_s0 + $0x48] sm:$0xff]  ;;  %v39_v7 = vld [vmem:[%s835_s0 + $0x10] sm:$0xff] }
   0x3   :  { %v45_v4 = vld [vmem:[%s835_s0 + $0x40] sm:$0xff]  ;;  %504 = vmatpush3.msk.msra.mxu0 %vm107_vm1, %v53_v2  ;;  %597 = vmatpush3.msk.msra.mxu1 %vm107_vm1, %v53_v2  ;;  %v47_v8 = vld [vmem:[%s835_s0 + $0x50] sm:$0xff]  ;;  %v40_v9 = vld [vmem:[%s835_s0 + $0x18] sm:$0xff] }
   0x4   :  { %505 = vmatprep.mubr.msk.f32.mxu0 %vm58_vm2, %v37_v3  ;;  %517 = vmatprep.mubr.msk.f32.mxu1 %vm58_vm2, %v45_v4  ;;  %v48_v10 = vld [vmem:[%s835_s0 + $0x58] sm:$0xff]  ;;  %v41_v11 = vld [vmem:[%s835_s0 + $0x20] sm:$0xff]  ;;  %v42_v17 = vld [vmem:[%s835_s0 + $0x28] sm:$0xff] }
   0x5   :  { %506 = vmatmul.mubr.msk.f32.vlgmr.msra.gmra.mrb[0].mxu0 %vm58_vm2, %v38_v5  ;;  %518 = vmatmul.mubr.msk.f32.vlgmr.msra.gmra.mrb[0].mxu1 %vm58_vm2, %v46_v6  ;;  %v702_v12 = vld [vmem:[%s836_s3 + $0x1] ss:$0 sm:$0xff]  ;;  %v710_v14 = vld [vmem:[%s836_s3 + $0x2] ss:$0 sm:$0xff]  ;;  %v715_v15 = vld [vmem:[%s836_s3 + $0x3] ss:$0 sm:$0xff] }
   0x6   :  { %508 = vmatprep.mubr.msk.f32.mxu0 %vm58_vm2, %v39_v7  ;;  %520 = vmatprep.mubr.msk.f32.mxu1 %vm58_vm2, %v47_v8  ;;  %v49_v13 = vld [vmem:[%s835_s0 + $0x60] sm:$0xff]  ;;  %v50_v18 = vld [vmem:[%s835_s0 + $0x68] sm:$0xff]  ;;  %v43_v19 = vld [vmem:[%s835_s0 + $0x30] sm:$0xff] }
   0x7   :  { %v51_v20 = vld [vmem:[%s835_s0 + $0x70] sm:$0xff]  ;;  %v44_v21 = vld [vmem:[%s835_s0 + $0x38] sm:$0xff]  ;;  %v445_v23 = vld [vmem:[%s836_s3] ss:$0 sm:$0xff] }
   0x8   :  { %v52_v22 = vld [vmem:[%s835_s0 + $0x78] sm:$0xff]  ;;  %s750_s0 = smov 0  }
   0x9   :  { %v717_v16 = vld [vmem:[#allocation4] ss:$0 sm:$0xff]  ;;  %509 = vmatmul.mubr.msk.f32.gmra.mrb[2].mxu0 %vm58_vm2, %v40_v9  ;;  %521 = vmatmul.mubr.msk.f32.gmra.mrb[2].mxu1 %vm58_vm2, %v48_v10 }
   0xa   :  { %511 = vmatprep.mubr.msk.f32.mxu0 %vm58_vm2, %v41_v11  ;;  %523 = vmatprep.mubr.msk.f32.mxu1 %vm58_vm2, %v49_v13 }
   0xd   :  { %512 = vmatmul.mubr.msk.f32.gmra.mrb[4].mxu0 %vm58_vm2, %v42_v17  ;;  %524 = vmatmul.mubr.msk.f32.gmra.mrb[4].mxu1 %vm58_vm2, %v50_v18 }
   0xe   :  { %514 = vmatprep.mubr.msk.f32.mxu0 %vm58_vm2, %v43_v19  ;;  %526 = vmatprep.mubr.msk.f32.mxu1 %vm58_vm2, %v51_v20 }
  0x11   :  { %515 = vmatmul.mubr.msk.f32.gmra.mrb[6].mxu0 %vm58_vm2, %v44_v21  ;;  %527 = vmatmul.mubr.msk.f32.gmra.mrb[6].mxu1 %vm58_vm2, %v52_v22 }
  0xd8   :  { %v507_v24 = vpop.f32.mrb[0].mxu0  ;;  %v519_v25 = vpop.f32.mrb[0].mxu1 }
  0xd9   :  { %v183_v26 = vadd.f32 %v507_v24, %v445_v23  ;;  %v223_v27 = vadd.f32 %v519_v25, %v445_v23  ;;  %v177_v28 = vpop.f32.mrb[1].mxu0  ;;  %v217_v29 = vpop.f32.mrb[1].mxu1 }
  0xda   :  { %v178_v30 = vadd.f32 %v445_v23, %v177_v28  ;;  %v218_v31 = vadd.f32 %v445_v23, %v217_v29 }
  0xdb   :  { %257 = vst [vmem:[#allocation2 + $0x8] sm:$0xff] %v183_v26  ;;  %265 = vst [vmem:[#allocation2 + $0x48] sm:$0xff] %v223_v27 }
  0xdc   :  { %256 = vst [vmem:[#allocation2] sm:$0xff] %v178_v30  ;;  %264 = vst [vmem:[#allocation2 + $0x40] sm:$0xff] %v218_v31  ;;  %v510_v32 = vpop.f32.mrb[2].mxu0  ;;  %v522_v33 = vpop.f32.mrb[2].mxu1 }
  0xdd   :  { %v193_v34 = vadd.f32 %v510_v32, %v445_v23  ;;  %v233_v35 = vadd.f32 %v522_v33, %v445_v23  ;;  %v187_v36 = vpop.f32.mrb[3].mxu0  ;;  %v227_v37 = vpop.f32.mrb[3].mxu1 }
  0xde   :  { %v188_v38 = vadd.f32 %v445_v23, %v187_v36  ;;  %v228_v39 = vadd.f32 %v445_v23, %v227_v37 }
  0xdf   :  { %259 = vst [vmem:[#allocation2 + $0x18] sm:$0xff] %v193_v34  ;;  %267 = vst [vmem:[#allocation2 + $0x58] sm:$0xff] %v233_v35 }
  0xe0   :  { %258 = vst [vmem:[#allocation2 + $0x10] sm:$0xff] %v188_v38  ;;  %266 = vst [vmem:[#allocation2 + $0x50] sm:$0xff] %v228_v39  ;;  %v513_v40 = vpop.f32.mrb[4].mxu0  ;;  %v525_v41 = vpop.f32.mrb[4].mxu1 }
  0xe1   :  { %v203_v42 = vadd.f32 %v513_v40, %v445_v23  ;;  %v243_v43 = vadd.f32 %v525_v41, %v445_v23  ;;  %v197_v44 = vpop.f32.mrb[5].mxu0  ;;  %v237_v45 = vpop.f32.mrb[5].mxu1 }
  0xe2   :  { %v198_v46 = vadd.f32 %v445_v23, %v197_v44  ;;  %v238_v47 = vadd.f32 %v445_v23, %v237_v45 }
  0xe3   :  { %261 = vst [vmem:[#allocation2 + $0x28] sm:$0xff] %v203_v42  ;;  %269 = vst [vmem:[#allocation2 + $0x68] sm:$0xff] %v243_v43 }
  0xe4   :  { %260 = vst [vmem:[#allocation2 + $0x20] sm:$0xff] %v198_v46  ;;  %268 = vst [vmem:[#allocation2 + $0x60] sm:$0xff] %v238_v47  ;;  %v516_v48 = vpop.f32.mrb[6].mxu0  ;;  %v528_v49 = vpop.f32.mrb[6].mxu1 }
  0xe5   :  { %v213_v50 = vadd.f32 %v516_v48, %v445_v23  ;;  %v253_v51 = vadd.f32 %v528_v49, %v445_v23  ;;  %v207_v52 = vpop.f32.mrb[7].mxu0  ;;  %v247_v53 = vpop.f32.mrb[7].mxu1 }
  0xe6   :  { %v208_v54 = vadd.f32 %v445_v23, %v207_v52  ;;  %v248_v55 = vadd.f32 %v445_v23, %v247_v53 }
  0xe7   :  { %263 = vst [vmem:[#allocation2 + $0x38] sm:$0xff] %v213_v50  ;;  %271 = vst [vmem:[#allocation2 + $0x78] sm:$0xff] %v253_v51 }
  0xe8   :  { %262 = vst [vmem:[#allocation2 + $0x30] sm:$0xff] %v208_v54  ;;  %270 = vst [vmem:[#allocation2 + $0x70] sm:$0xff] %v248_v55 }
  0xe9 LB: > { %v311_v56 = vld [vmem:[%s832_s4] sm:$0xff]  ;;  %v618_v57 = vmov 0   ;;  %v312_v58 = vld [vmem:[%s832_s4 + $0x8] sm:$0xff]  ;;  %v313_v59 = vld [vmem:[%s832_s4 + $0x10] sm:$0xff]  ;;  %s768_s20 = sshll.u32 %s615_s0, 4  ;;  %s277_s0 = sadd.s32 1, %s615_s0   ;;  %s615_s0 = sphi %s750_s0, %s277_s0  }
  0xea   : > { %608 = vset.pattern.permute.xlu0 %v618_v57  ;;  %v314_v60 = vld [vmem:[%s832_s4 + $0x18] sm:$0xff]  ;;  %v564_v61 = vpack.c.bf16 %v312_v58, %v311_v56  ;;  %s279_s23 = scalar_lea.vmem %s830_s1, %s768_s20  ;;  %v284_v63 = vld [vmem:[#allocation3] sm:$0xff]  ;;  %v316_v1 = vld [vmem:[%s832_s4 + $0x28] sm:$0xff]  ;;  %s288_s22 = scalar_lea.vmem [#allocation2], %s768_s20 }
  0xeb   : > { %v568_v62 = vpack.c.bf16 %v314_v60, %v313_v59  ;;  %v315_v0 = vld [vmem:[%s832_s4 + $0x20] sm:$0xff]  ;;  %v281_v3 = vld [vmem:[%s279_s23 + $0x8] sm:$0xff]  ;;  %v317_v7 = vld [vmem:[%s832_s4 + $0x30] sm:$0xff]  ;;  %s424_s25 = scalar_lea.vmem %s834_s6, %s768_s20  ;;  %p274_p0 = scmp.ge.s32.totalorder %s277_s0, 8  }
  0xec   : > { %v280_v2 = vld [vmem:[%s279_s23] sm:$0xff]  ;;  %565 = vmatprep.subr.bf16.mxu0 %v564_v61  ;;  %vm283_vm4 = vcmp.ne.f32.partialorder %v281_v3, %v281_v3  ;;  %v285_v4 = vld [vmem:[#allocation3 + $0x8] sm:$0xff]  ;;  %v572_v6 = vpack.c.bf16 %v316_v1, %v315_v0  ;;  %v318_v8 = vld [vmem:[%s832_s4 + $0x38] sm:$0xff] }
  0xed   : > { %vm282_vm3 = vcmp.ne.f32.partialorder %v280_v2, %v280_v2  ;;  %567 = vmatpush3.bf16.msra.mxu0 %v564_v61  ;;  %v287_v9 = vsel %vm283_vm4, %v285_v4, %v281_v3  ;;  %v576_v10 = vpack.c.bf16 %v318_v8, %v317_v7  ;;  %v319_v11 = vld [vmem:[%s832_s4 + $0x40] sm:$0xff]  ;;  %v320_v13 = vld [vmem:[%s832_s4 + $0x48] sm:$0xff]  ;;  %v321_v18 = vld [vmem:[%s832_s4 + $0x50] sm:$0xff] }
  0xee   : > { %v286_v5 = vsel %vm282_vm3, %v284_v63, %v280_v2  ;;  %569 = vmatprep.subr.bf16.mxu0 %v568_v62  ;;  %v580_v17 = vpack.c.bf16 %v320_v13, %v319_v11  ;;  %v322_v19 = vld [vmem:[%s832_s4 + $0x58] sm:$0xff]  ;;  %v323_v21 = vld [vmem:[%s832_s4 + $0x60] sm:$0xff]  ;;  %v324_v22 = vld [vmem:[%s832_s4 + $0x68] sm:$0xff] }
  0xef   : > { %293 = vperm.xlu0 %608, %v286_v5   ;;  %v584_v20 = vpack.c.bf16 %v322_v19, %v321_v18  ;;  %v588_v23 = vpack.c.bf16 %v324_v22, %v323_v21  ;;  %v325_v24 = vld [vmem:[%s832_s4 + $0x70] sm:$0xff]  ;;  %v326_v25 = vld [vmem:[%s832_s4 + $0x78] sm:$0xff]  ;;  %v289_v28 = vld [vmem:[%s288_s22] sm:$0xff] }
  0xf0   : > { %v592_v26 = vpack.c.bf16 %v326_v25, %v325_v24  ;;  %v290_v31 = vld [vmem:[%s288_s22 + $0x8] sm:$0xff] }
  0xf1   : > { %571 = vmatpush3.bf16.msra.mxu0 %v568_v62 }
  0xf2   : > { %573 = vmatprep.subr.bf16.mxu0 %v572_v6 }
  0xf3   : > { %298 = vperm.xlu0 %608, %v287_v9  }
  0xf5   : > { %575 = vmatpush3.bf16.msra.mxu0 %v572_v6 }
  0xf6   : > { %577 = vmatprep.subr.bf16.mxu0 %v576_v10 }
  0xf9   : > { %579 = vmatpush3.bf16.msra.mxu0 %v576_v10 }
  0xfa   : > { %581 = vmatprep.subr.bf16.mxu0 %v580_v17 }
  0xfd   : > { %583 = vmatpush3.bf16.msra.mxu0 %v580_v17 }
  0xfe   : > { %585 = vmatprep.subr.bf16.mxu0 %v584_v20 }
 0x101   : > { %587 = vmatpush3.bf16.msra.mxu0 %v584_v20 }
 0x102   : > { %589 = vmatprep.subr.bf16.mxu0 %v588_v23 }
 0x105   : > { %591 = vmatpush3.bf16.msra.mxu0 %v588_v23 }
 0x106   : > { %593 = vmatprep.subr.bf16.mxu0 %v592_v26 }
 0x109   : > { %595 = vmatpush3.bf16.msra.mxu0 %v592_v26 }
 0x16e   : > { %v294_v27 = vpop.permute.xlu0 %293 }
 0x16f   : > { %v305_v29 = vmul.f32 %v702_v12, %v294_v27 }
 0x171   : > { %v307_v30 = vadd.f32 %v305_v29, %v289_v28 }
 0x172   : > { %v299_v32 = vpop.permute.xlu0 %298 }
 0x173   : > { %v306_v33 = vmul.f32 %v702_v12, %v299_v32  ;;  %v309_v34 = vmax.f32 %v307_v30, 0.0 }
 0x175   : > { %v308_v35 = vadd.f32 %v306_v33, %v290_v31  ;;  %561 = vmatprep.mubr.f32.mxu0 %v309_v34 }
 0x177   : > { %v310_v36 = vmax.f32 %v308_v35, 0.0 }
 0x179   : > { %562 = vmatmul.mubr.f32.vlgmr.msra.gmra.mrb[0].mxu0 %v310_v36 }
 0x24c   : > { %v563_v37 = vpop.f32.mrb[0].mxu0 }
 0x24d   : > { %v397_v38 = vpop.f32.mrb[1].mxu0  ;;  %v403_v40 = vadd.f32 %v563_v37, %v710_v14 }
 0x24e   : > { %v398_v39 = vadd.f32 %v710_v14, %v397_v38 }
 0x24f   : > { %v411_v42 = vmul.f32 %v715_v15, %v403_v40 }
 0x250   : > { %v410_v41 = vmul.f32 %v715_v15, %v398_v39 }
 0x252   : > { %412 = vadd.xlane.f32.xlu1 %v410_v41 }
 0x256   : > { %414 = vadd.xlane.f32.xlu1 %v411_v42 }
 0x2df   : > { %v413_v43 = vpop.xlane.xlu1 %412 }
 0x2e0   : > { %v422_v44 = vadd.f32 %v717_v16, %v413_v43  ;;  %276 = sbr.rel (!%p274_p0) target bundleno = 233 (0xe9), region = 58 }
 0x2e2   : > { %426 = vst.msk [vmem:[%s424_s25] sm:$0xff] %vm29_vm0, %v422_v44  ;;  %428 = vst.msk [vmem:[#allocation3] sm:$0xff] %vm29_vm0, %v422_v44 }
 0x2e3   : > { %v415_v45 = vpop.xlane.xlu1 %414 }
 0x2e4   : > { %v423_v46 = vadd.f32 %v717_v16, %v415_v45 }
 0x2e6   : > { %427 = vst.msk [vmem:[%s424_s25 + $0x8] sm:$0xff] %vm29_vm0, %v423_v46  ;;  %429 = vst.msk [vmem:[#allocation3 + $0x8] sm:$0xff] %vm29_vm0, %v423_v46 }

</bundles_post_ra>
